<compile_context>
chip_gen: v7x
topology: tpu7x:2x2x1
jax: 0.10.0
libtpu: 0.0.40
codegen_flags: <defaults>
</compile_context>

<pallas_src>
import functools

import jax
import jax.numpy as jnp
from jax.experimental import pallas as pl
from jax.experimental.pallas import tpu as pltpu


def _pick_tile(total, candidates):
    """Largest candidate that evenly divides `total`, else the full extent."""
    for t in candidates:
        if t <= total and total % t == 0:
            return t
    return total


def _ff_kernel(x_ref, scale1_ref, shift_ref, w_in_ref, w_out_ref, o_ref,
               xn_sc, acc_sc, *, eps, inv_d):
    k = pl.program_id(2)  # Dh-chunk (reduction) axis, innermost

    @pl.when(k == 0)
    def _():
        # LayerNorm (scale=False), single fused pass for the statistics.
        x = x_ref[...].astype(jnp.float32)                      # (n_tile, D)
        s1 = jnp.sum(x, axis=-1, keepdims=True)
        s2 = jnp.sum(x * x, axis=-1, keepdims=True)
        mean = s1 * inv_d
        var = s2 * inv_d - mean * mean                          # population variance
        xn = (x - mean) * jax.lax.rsqrt(jnp.maximum(var, eps))  # var.clamp(min=eps).rsqrt()
        xn_sc[...] = xn.astype(xn_sc.dtype)                     # cache bf16 matmul operand
        acc_sc[...] = jnp.zeros_like(acc_sc)

    # proj_in chunk: (n_tile, D) @ (D, dh_tile) on the MXU, f32 accumulation.
    h = jnp.dot(xn_sc[...], w_in_ref[...], preferred_element_type=jnp.float32)
    h = h * jax.nn.sigmoid(h)                                   # SiLU (EUP), f32

    # scale/shift epilogue for this Dh chunk (broadcast over rows); (+1) pre-applied in wrapper.
    y = h * scale1_ref[...] + shift_ref[...]                    # (n_tile, dh_tile) f32

    # proj_out chunk, accumulated over Dh chunks.  Dropout(p=0.0) is identity.
    acc_sc[...] += jnp.dot(y.astype(w_out_ref.dtype), w_out_ref[...],
                           preferred_element_type=jnp.float32)

    @pl.when(k == pl.num_programs(2) - 1)
    def _():
        o_ref[...] = acc_sc[...].astype(o_ref.dtype)


def feedforward_pallas(x, emb, w_in, w_ss, b_ss, w_out, *, matmul_dtype=jnp.bfloat16):
    B, N, D = x.shape
    Dh = w_in.shape[-1]
    assert w_out.shape == (Dh, D)
    eps = 1e-5 if x.dtype == jnp.float32 else 1e-3

    # --- tiny per-batch emb path hoisted out of the kernel (plain XLA) ---
    # Removes W_ss / b_ss / emb from VMEM and keeps the chunk() split lane-aligned.
    e = emb.astype(jnp.float32)
    e = e * jax.nn.sigmoid(e)
    ss = jnp.dot(e, w_ss.astype(jnp.float32), preferred_element_type=jnp.float32) + b_ss
    scale1 = (ss[:, :Dh] + 1.0).reshape(B, 1, Dh)   # (scale + 1) folded here
    shift = ss[:, Dh:].reshape(B, 1, Dh)

    # bf16 matmul operands (MXU-native); accumulation stays f32 in the kernel.
    w_in_c = w_in.astype(matmul_dtype)
    w_out_c = w_out.astype(matmul_dtype)

    # Tiling: rows of (B, N) and chunks of Dh.
    n_tile = _pick_tile(N, (512, 256, 128, 64, 32, 16, 8))
    dh_tile = _pick_tile(Dh, (512, 256, 128))
    n_row_tiles = N // n_tile
    n_dh_chunks = Dh // dh_tile

    kernel = functools.partial(_ff_kernel, eps=eps, inv_d=1.0 / D)

    itemsize = jnp.dtype(x.dtype).itemsize
    cost = pl.CostEstimate(
        flops=4 * B * N * D * Dh,                         # two matmuls
        transcendentals=B * N * Dh + B * N,               # SiLU sigmoids + rsqrt
        bytes_accessed=(2 * B * N * D * itemsize          # x + out
                        + (w_in_c.size + w_out_c.size) * 2
                        + 2 * B * Dh * 4),                # scale + shift
    )

    return pl.pallas_call(
        kernel,
        out_shape=jax.ShapeDtypeStruct((B, N, D), x.dtype),
        grid_spec=pltpu.PrefetchScalarGridSpec(
            num_scalar_prefetch=0,
            grid=(B, n_row_tiles, n_dh_chunks),
            in_specs=[
                pl.BlockSpec((None, n_tile, D), lambda b, r, k: (b, r, 0)),   # x rows
                pl.BlockSpec((None, 1, dh_tile), lambda b, r, k: (b, 0, k)),  # scale + 1
                pl.BlockSpec((None, 1, dh_tile), lambda b, r, k: (b, 0, k)),  # shift
                pl.BlockSpec((D, dh_tile), lambda b, r, k: (0, k)),           # W_in chunk
                pl.BlockSpec((dh_tile, D), lambda b, r, k: (k, 0)),           # W_out chunk
            ],
            out_specs=pl.BlockSpec((None, n_tile, D), lambda b, r, k: (b, r, 0)),
            scratch_shapes=[
                pltpu.VMEM((n_tile, D), matmul_dtype),   # cached normalized x (bf16)
                pltpu.VMEM((n_tile, D), jnp.float32),    # output accumulator
            ],
        ),
        compiler_params=pltpu.CompilerParams(
            dimension_semantics=("parallel", "parallel", "arbitrary"),
            vmem_limit_bytes=48 * 1024 * 1024,
        ),
        cost_estimate=cost,
    )(x, scale1, shift, w_in_c, w_out_c)


def feedforward_ref(x, emb, w_in, w_ss, b_ss, w_out, matmul_dtype=None):
    """Pure-JAX reference of the PyTorch forward (optionally with bf16 matmul operands)."""
    eps = 1e-5 if x.dtype == jnp.float32 else 1e-3
    mean = jnp.mean(x, axis=-1, keepdims=True)
    var = jnp.mean((x - mean) ** 2, axis=-1, keepdims=True)
    xn = (x - mean) * jax.lax.rsqrt(jnp.maximum(var, eps))
    e = emb * jax.nn.sigmoid(emb)
    ss = jnp.dot(e, w_ss, preferred_element_type=jnp.float32) + b_ss
    dh = w_in.shape[-1]
    scale, shift = ss[:, :dh], ss[:, dh:]
    if matmul_dtype is not None:
        xn, w_in, w_out = (a.astype(matmul_dtype) for a in (xn, w_in, w_out))
    h = jnp.dot(xn, w_in, preferred_element_type=jnp.float32)
    h = h * jax.nn.sigmoid(h)
    y = h * (scale[:, None, :] + 1.0) + shift[:, None, :]
    if matmul_dtype is not None:
        y = y.astype(matmul_dtype)
    out = jnp.dot(y, w_out, preferred_element_type=jnp.float32)
    return out.astype(x.dtype)


if __name__ == "__main__":
    # Small shapes consistent with FeedForward(dim, emb_dim, norm, mult=4).
    B, N, D, E, MULT = 2, 16, 32, 16, 4
    Dh = D * MULT  # 128

    key = jax.random.PRNGKey(0)
    k_x, k_e, k_in, k_ss, k_b, k_out = jax.random.split(key, 6)

    x = jax.random.normal(k_x, (B, N, D), dtype=jnp.float32)
    emb = jax.random.normal(k_e, (B, E), dtype=jnp.float32)

    # Deterministic params ("math layout": kernel computes x @ W directly).  The real module
    # zero-inits to_scale_shift; random values here exercise the emb path.
    w_in = jax.random.uniform(k_in, (D, Dh), jnp.float32, -1.0, 1.0) / jnp.sqrt(D)
    w_ss = jax.random.uniform(k_ss, (E, 2 * Dh), jnp.float32, -1.0, 1.0) / jnp.sqrt(E)
    b_ss = jax.random.uniform(k_b, (2 * Dh,), jnp.float32, -0.1, 0.1)
    w_out = jax.random.uniform(k_out, (Dh, D), jnp.float32, -1.0, 1.0) / jnp.sqrt(Dh)

    out = feedforward_pallas(x, emb, w_in, w_ss, b_ss, w_out)
    out = jax.block_until_ready(out)
    assert out.shape == (B, N, D)

    # Tight check vs a reference using the same bf16 matmul operands.
    ref_mixed = feedforward_ref(x, emb, w_in, w_ss, b_ss, w_out, matmul_dtype=jnp.bfloat16)
    assert jnp.allclose(out, ref_mixed, rtol=1e-2, atol=1e-2), (
        "mismatch vs bf16-operand reference: max err "
        f"{float(jnp.max(jnp.abs(out - ref_mixed)))}")

    # Looser sanity check vs the full-f32 reference of the PyTorch forward.
    ref_f32 = feedforward_ref(x, emb, w_in, w_ss, b_ss, w_out)
    assert jnp.allclose(out, ref_f32, rtol=5e-2, atol=5e-2), (
        "mismatch vs f32 reference: max err "
        f"{float(jnp.max(jnp.abs(out - ref_f32)))}")

    print("KERNEL_OK")
</pallas_src>

<mosaic_0001>
module attributes {stable_mosaic.version = 11 : i64} {
  func.func @_ff_kernel(%arg0: i32, %arg1: i32, %arg2: i32, %arg3: memref<1x16x32xf32, #tpu.memory_space<vmem>>, %arg4: memref<1x1x128xf32, #tpu.memory_space<vmem>>, %arg5: memref<1x1x128xf32, #tpu.memory_space<vmem>>, %arg6: memref<32x128xbf16, #tpu.memory_space<vmem>>, %arg7: memref<128x32xbf16, #tpu.memory_space<vmem>>, %arg8: memref<1x16x32xf32, #tpu.memory_space<vmem>>, %arg9: memref<16x32xbf16, #tpu.memory_space<vmem>>, %arg10: memref<16x32xf32, #tpu.memory_space<vmem>>) attributes {dimension_semantics = [#tpu.dimension_semantics<parallel>, #tpu.dimension_semantics<parallel>, #tpu.dimension_semantics<arbitrary>], iteration_bounds = array<i64: 2, 1, 1>, scalar_prefetch = 0 : i64, scratch_operands = 2 : i64, tpu.core_type = #tpu.core_type<tc>, window_params = [{transform_indices = @transform_0, window_bounds = array<i64: 1, 16, 32>}, {transform_indices = @transform_1, window_bounds = array<i64: 1, 1, 128>}, {transform_indices = @transform_2, window_bounds = array<i64: 1, 1, 128>}, {transform_indices = @transform_3, window_bounds = array<i64: 32, 128>}, {transform_indices = @transform_4, window_bounds = array<i64: 128, 32>}, {transform_indices = @transform_5, window_bounds = array<i64: 1, 16, 32>}]} {
    %c0_i32 = arith.constant 0 : i32
    %0 = arith.cmpi eq, %arg2, %c0_i32 : i32
    %1 = arith.extui %0 : i1 to i32
    %c0_i32_0 = arith.constant 0 : i32
    %2 = arith.cmpi ne, %1, %c0_i32_0 : i32
    scf.if %2 {
      %c0_20 = arith.constant 0 : index
      %c0_21 = arith.constant 0 : index
      %c0_22 = arith.constant 0 : index
      %29 = vector.load %arg3[%c0_20, %c0_21, %c0_22] : memref<1x16x32xf32, #tpu.memory_space<vmem>>, vector<1x16x32xf32>
      %30 = vector.shape_cast %29 : vector<1x16x32xf32> to vector<16x32xf32>
      %cst_23 = arith.constant dense<0.000000e+00> : vector<16xf32>
      %31 = vector.multi_reduction <add>, %30, %cst_23 [1] : vector<16x32xf32> to vector<16xf32>
      %32 = vector.shape_cast %31 : vector<16xf32> to vector<16x1xf32>
      %33 = arith.mulf %30, %30 : vector<16x32xf32>
      %cst_24 = arith.constant dense<0.000000e+00> : vector<16xf32>
      %34 = vector.multi_reduction <add>, %33, %cst_24 [1] : vector<16x32xf32> to vector<16xf32>
      %35 = vector.shape_cast %34 : vector<16xf32> to vector<16x1xf32>
      %cst_25 = arith.constant 3.125000e-02 : f32
      %36 = vector.broadcast %cst_25 : f32 to vector<16x1xf32>
      %37 = arith.mulf %32, %36 : vector<16x1xf32>
      %cst_26 = arith.constant 3.125000e-02 : f32
      %38 = vector.broadcast %cst_26 : f32 to vector<16x1xf32>
      %39 = arith.mulf %35, %38 : vector<16x1xf32>
      %40 = arith.mulf %37, %37 : vector<16x1xf32>
      %41 = arith.subf %39, %40 : vector<16x1xf32>
      %42 = vector.broadcast %37 : vector<16x1xf32> to vector<16x32xf32>
      %43 = arith.subf %30, %42 : vector<16x32xf32>
      %cst_27 = arith.constant 9.99999974E-6 : f32
      %44 = vector.broadcast %cst_27 : f32 to vector<16x1xf32>
      %45 = arith.maximumf %41, %44 : vector<16x1xf32>
      %46 = math.rsqrt %45 : vector<16x1xf32>
      %47 = vector.broadcast %46 : vector<16x1xf32> to vector<16x32xf32>
      %48 = arith.mulf %43, %47 : vector<16x32xf32>
      %49 = arith.truncf %48 : vector<16x32xf32> to vector<16x32xbf16>
      %c0_28 = arith.constant 0 : index
      %c0_29 = arith.constant 0 : index
      %50 = vector.load %arg9[%c0_28, %c0_29] : memref<16x32xbf16, #tpu.memory_space<vmem>>, vector<16x32xbf16>
      tpu.vector_store %arg9[%c0_28, %c0_29], %49 {strides = array<i32>} : memref<16x32xbf16, #tpu.memory_space<vmem>>, vector<16x32xbf16>,
      %cst_30 = arith.constant 0.000000e+00 : f32
      %51 = vector.broadcast %cst_30 : f32 to vector<16x32xf32>
      %c0_31 = arith.constant 0 : index
      %c0_32 = arith.constant 0 : index
      %52 = vector.load %arg10[%c0_31, %c0_32] : memref<16x32xf32, #tpu.memory_space<vmem>>, vector<16x32xf32>
      tpu.vector_store %arg10[%c0_31, %c0_32], %51 {strides = array<i32>} : memref<16x32xf32, #tpu.memory_space<vmem>>, vector<16x32xf32>,
    } else {
    }
    %c0 = arith.constant 0 : index
    %c0_1 = arith.constant 0 : index
    %3 = vector.load %arg9[%c0, %c0_1] : memref<16x32xbf16, #tpu.memory_space<vmem>>, vector<16x32xbf16>
    %c0_2 = arith.constant 0 : index
    %c0_3 = arith.constant 0 : index
    %4 = vector.load %arg6[%c0_2, %c0_3] : memref<32x128xbf16, #tpu.memory_space<vmem>>, vector<32x128xbf16>
    %cst = arith.constant dense<0.000000e+00> : vector<16x128xf32>
    %5 = tpu.matmul %3, %4, %cst {dimension_numbers = #tpu.dot_dimension_numbers<[1], [0], [0], [1], [0, 0, 1, 1], [], []>} : vector<16x32xbf16>, vector<32x128xbf16>, vector<16x128xf32> -> vector<16x128xf32>
    %6 = arith.negf %5 : vector<16x128xf32>
    %7 = math.exp %6 : vector<16x128xf32>
    %cst_4 = arith.constant 1.000000e+00 : f32
    %8 = vector.broadcast %cst_4 : f32 to vector<16x128xf32>
    %9 = arith.addf %8, %7 : vector<16x128xf32>
    %10 = arith.divf %8, %9 : vector<16x128xf32>
    %11 = arith.mulf %5, %10 : vector<16x128xf32>
    %c0_5 = arith.constant 0 : index
    %c0_6 = arith.constant 0 : index
    %c0_7 = arith.constant 0 : index
    %12 = vector.load %arg4[%c0_5, %c0_6, %c0_7] : memref<1x1x128xf32, #tpu.memory_space<vmem>>, vector<1x1x128xf32>
    %13 = vector.shape_cast %12 : vector<1x1x128xf32> to vector<1x128xf32>
    %14 = vector.broadcast %13 : vector<1x128xf32> to vector<16x128xf32>
    %15 = arith.mulf %11, %14 : vector<16x128xf32>
    %c0_8 = arith.constant 0 : index
    %c0_9 = arith.constant 0 : index
    %c0_10 = arith.constant 0 : index
    %16 = vector.load %arg5[%c0_8, %c0_9, %c0_10] : memref<1x1x128xf32, #tpu.memory_space<vmem>>, vector<1x1x128xf32>
    %17 = vector.shape_cast %16 : vector<1x1x128xf32> to vector<1x128xf32>
    %18 = vector.broadcast %17 : vector<1x128xf32> to vector<16x128xf32>
    %19 = arith.addf %15, %18 : vector<16x128xf32>
    %c0_11 = arith.constant 0 : index
    %c0_12 = arith.constant 0 : index
    %20 = vector.load %arg10[%c0_11, %c0_12] : memref<16x32xf32, #tpu.memory_space<vmem>>, vector<16x32xf32>
    %21 = arith.truncf %19 : vector<16x128xf32> to vector<16x128xbf16>
    %c0_13 = arith.constant 0 : index
    %c0_14 = arith.constant 0 : index
    %22 = vector.load %arg7[%c0_13, %c0_14] : memref<128x32xbf16, #tpu.memory_space<vmem>>, vector<128x32xbf16>
    %cst_15 = arith.constant dense<0.000000e+00> : vector<16x32xf32>
    %23 = tpu.matmul %21, %22, %cst_15 {dimension_numbers = #tpu.dot_dimension_numbers<[1], [0], [0], [1], [0, 0, 1, 1], [], []>} : vector<16x128xbf16>, vector<128x32xbf16>, vector<16x32xf32> -> vector<16x32xf32>
    %24 = arith.addf %20, %23 : vector<16x32xf32>
    %c0_16 = arith.constant 0 : index
    %c0_17 = arith.constant 0 : index
    %25 = vector.load %arg10[%c0_16, %c0_17] : memref<16x32xf32, #tpu.memory_space<vmem>>, vector<16x32xf32>
    tpu.vector_store %arg10[%c0_16, %c0_17], %24 {strides = array<i32>} : memref<16x32xf32, #tpu.memory_space<vmem>>, vector<16x32xf32>,
    %c0_i32_18 = arith.constant 0 : i32
    %26 = arith.cmpi eq, %arg2, %c0_i32_18 : i32
    %27 = arith.extui %26 : i1 to i32
    %c0_i32_19 = arith.constant 0 : i32
    %28 = arith.cmpi ne, %27, %c0_i32_19 : i32
    scf.if %28 {
      %c0_20 = arith.constant 0 : index
      %c0_21 = arith.constant 0 : index
      %29 = vector.load %arg10[%c0_20, %c0_21] : memref<16x32xf32, #tpu.memory_space<vmem>>, vector<16x32xf32>
      %c0_22 = arith.constant 0 : index
      %c0_23 = arith.constant 0 : index
      %c0_24 = arith.constant 0 : index
      %30 = vector.load %arg8[%c0_22, %c0_23, %c0_24] : memref<1x16x32xf32, #tpu.memory_space<vmem>>, vector<1x16x32xf32>
      %31 = vector.shape_cast %30 : vector<1x16x32xf32> to vector<16x32xf32>
      %32 = vector.shape_cast %29 : vector<16x32xf32> to vector<1x16x32xf32>
      tpu.vector_store %arg8[%c0_22, %c0_23, %c0_24], %32 {strides = array<i32>} : memref<1x16x32xf32, #tpu.memory_space<vmem>>, vector<1x16x32xf32>,
    } else {
    }
    return
  }
  func.func @transform_0(%arg0: i32, %arg1: i32, %arg2: i32) -> (i32, i32, i32) {
    %c0_i32 = arith.constant 0 : i32
    %c0_i32_0 = arith.constant 0 : i32
    return %arg0, %arg1, %c0_i32 : i32, i32, i32
  }
  func.func @transform_1(%arg0: i32, %arg1: i32, %arg2: i32) -> (i32, i32, i32) {
    %c0_i32 = arith.constant 0 : i32
    %c0_i32_0 = arith.constant 0 : i32
    return %arg0, %c0_i32, %arg2 : i32, i32, i32
  }
  func.func @transform_2(%arg0: i32, %arg1: i32, %arg2: i32) -> (i32, i32, i32) {
    %c0_i32 = arith.constant 0 : i32
    %c0_i32_0 = arith.constant 0 : i32
    return %arg0, %c0_i32, %arg2 : i32, i32, i32
  }
  func.func @transform_3(%arg0: i32, %arg1: i32, %arg2: i32) -> (i32, i32) {
    %c0_i32 = arith.constant 0 : i32
    %c0_i32_0 = arith.constant 0 : i32
    return %c0_i32, %arg2 : i32, i32
  }
  func.func @transform_4(%arg0: i32, %arg1: i32, %arg2: i32) -> (i32, i32) {
    %c0_i32 = arith.constant 0 : i32
    %c0_i32_0 = arith.constant 0 : i32
    return %arg2, %c0_i32 : i32, i32
  }
  func.func @transform_5(%arg0: i32, %arg1: i32, %arg2: i32) -> (i32, i32, i32) {
    %c0_i32 = arith.constant 0 : i32
    %c0_i32_0 = arith.constant 0 : i32
    return %arg0, %arg1, %c0_i32 : i32, i32, i32
  }
}

</mosaic_0001>

<bundles_post_ra>
// kernel: tpu_custom_call.1
= control target key start
LH: loop header
LB: loop body
LE: loop exit
PB: predicated region body
PF: predicated region fallthrough
CT: control target
= control target key end

     0   :  { %10 = vsyncpa [#allocation5], 0  ;;  %s1193_s0 = inlined_call_operand.vmem [shape: f32[2,16,32], index: 0, kind: input, shape index: {}]   ;;  %s1194_s1 = inlined_call_operand.vmem [shape: f32[2,1,128], index: 1, kind: input, shape index: {}]   ;;  %s1195_s2 = inlined_call_operand.vmem [shape: f32[2,1,128], index: 2, kind: input, shape index: {}]   ;;  %s1196_s3 = inlined_call_operand.vmem [shape: bf16[32,128], index: 3, kind: input, shape index: {}]   ;;  %s1197_s4 = inlined_call_operand.vmem [shape: bf16[128,32], index: 4, kind: input, shape index: {}]   ;;  %s1198_s5 = inlined_call_operand.hbm [shape: f32[2,16,32], index: 5, kind: output, shape index: {}]  }
   0x1   :  { %12 = vsyncpa [#allocation5 + $0x1], 0  ;;  %s1025_s18 = smov 0   ;;  %s1027_s19 = smov 0  }
   0x2   :  { %s1029_s20 = smov 0   ;;  %s1031_s21 = smov 0  }
   0x3   :  { %s1033_s22 = smov 0   ;;  %s1035_s23 = smov 0  }
   0x4 LB: > { %s757_s24 = sadd.s32 4294967295, %s988_s23   ;;  %s758_s25 = sadd.s32 4294967294, %s988_s23   ;;  %s988_s23 = sphi %s1035_s23, %s18_s23   ;;  %s984_s22 = sphi %s1033_s22, %s1205_s22   ;;  %s980_s21 = sphi %s1031_s21, %s1204_s21   ;;  %s976_s20 = sphi %s1029_s20, %s1203_s20   ;;  %s972_s19 = sphi %s1027_s19, %s1202_s19   ;;  %s968_s18 = sphi %s1025_s18, %s1201_s18  }
   0x5   : > { %s37_s26 = sadd.s32 1, %s984_s22  ;;  %s182_s27 = sadd.s32 1, %s976_s20 }
   0x6   : > { %p39_p0 = scmp.ge.s32.totalorder %s37_s26, 2  ;;  %p192_p1 = scmp.ne.s32.totalorder %s976_s20, %s972_s19 }
   0x7   : > { %p193_p2 = scmp.eq.s32.totalorder %s757_s24, 1  ;;  %p198_p3 = scmp.ne.s32.totalorder %s972_s19, %s968_s18 }
   0x8   : > { %s1207_s26 = smov (%p39_p0, %s37_s26), 0  ;;  %p199_p5 = scmp.eq.s32.totalorder %s758_s25, 1 }
   0x9   : > { %p1065_p4 = por %p193_p2, %p192_p1  ;;  %s177_s29 = ssub.s32 %s984_s22, %s1207_s26 }
   0xa   : > { %p763_p6 = scmp.ge.s32.totalorder %s988_s23, 1  ;;  %p180_p7 = scmp.eq.s32.totalorder %s177_s29, 0 }
   0xb   : > { %p1072_p8 = por %p199_p5, %p198_p3  ;;  %p264_p9 = scmp.lt.s32.totalorder %s988_s23, 3 }
   0xc   : > { %s1078_s6 = scalar_select %p180_p7, %s976_s20, %s182_s27  }
   0xd   : > { %p265_p10 = pnand %p763_p6, %p264_p9 }
   0xe   : > { %p318_p11 = scmp.lt.s32.totalorder (!%p265_p10), %s980_s21, 1  ;;  %vm357_vm0 = vcmask (!%p265_p10), 261120   ;;  %v888_v8 = vld [vmem:[%s1196_s3] sm:$0xff] (!%p265_p10)   ;;  %v990_v9 = vmov (!%p265_p10), 0.0   ;;  %v889_v10 = vld [vmem:[%s1196_s3 + $0x8] sm:$0xff] (!%p265_p10)   ;;  %vm991_vm1 = vmmov (!%p265_p10), 0  }
   0xf   : > { %268 = sbr.rel (%p265_p10) target bundleno = 692 (0x2b4), region = 40  ;;  %801 = vmatprep.subr.bf16.mxu0 (!%p265_p10), %v990_v9  ;;  %390 = vst.msk [vmem:[#allocation3] sm:$0xff] (!%p265_p10), %vm357_vm0, %v990_v9  ;;  %391 = vst.msk [vmem:[#allocation3 + $0x8] sm:$0xff] (!%p265_p10), %vm357_vm0, %v990_v9  ;;  %809 = vmatprep.subr.bf16.mxu1 (!%p265_p10), %v990_v9  ;;  %v890_v33 = vld [vmem:[%s1197_s4] sm:$0xff] (!%p265_p10)   ;;  %v891_v34 = vld [vmem:[%s1197_s4 + $0x8] sm:$0xff] (!%p265_p10)   ;;  %s314_s10 = sand.u32 (!%p265_p10), 1, %s972_s19  }
  0x10   : > { %802 = vmatpush3.bf16.msra.mxu0 (!%p265_p10), %v888_v8  ;;  %805 = vmatprep.mubr.msk.bf16.mxu0 (!%p265_p10), %vm991_vm1, %v990_v9  ;;  %v892_v35 = vld [vmem:[%s1197_s4 + $0x10] sm:$0xff] (!%p265_p10)   ;;  %v893_v36 = vld [vmem:[%s1197_s4 + $0x18] sm:$0xff] (!%p265_p10)   ;;  %v894_v37 = vld [vmem:[%s1197_s4 + $0x20] sm:$0xff] (!%p265_p10)   ;;  %s1147_s17 = scalar_lea.sflag (!%p265_p10), [#allocation5], %s314_s10  ;;  %s992_s24 = smov (!%p265_p10), [#allocation4]  }
  0x11   : > { %803 = vmatprep.subr.bf16.mxu0 (!%p265_p10), %v990_v9  ;;  %825 = vmatprep.mubr.msk.bf16.mxu1 (!%p265_p10), %vm991_vm1, %v990_v9  ;;  %v895_v38 = vld [vmem:[%s1197_s4 + $0x28] sm:$0xff] (!%p265_p10)   ;;  %v896_v39 = vld [vmem:[%s1197_s4 + $0x30] sm:$0xff] (!%p265_p10)   ;;  %v897_v40 = vld [vmem:[%s1197_s4 + $0x38] sm:$0xff] (!%p265_p10)   ;;  %s914_s25 = sshll.u32 (!%p265_p10), %s992_s24, 4  ;;  %s915_s25 = int_to_ptr.vmem [resolvable:$false] %s914_s25 }
  0x12   : > { %810 = vmatpush3.bf16.msra.mxu1 (!%p265_p10), %v890_v33 }
  0x13   : > { %811 = vmatprep.subr.bf16.mxu1 (!%p265_p10), %v990_v9 }
  0x14   : > { %804 = vmatpush3.bf16.msra.mxu0 (!%p265_p10), %v889_v10 }
  0x16   : > { %s1082_s7 = scalar_select %p318_p11, %s980_s21, 1  ;;  %812 = vmatpush3.bf16.msra.mxu1 %v891_v34  ;;  %v486_v62 = vld [vmem:[#allocation3] sm:$0xff] }
  0x17   : > { %813 = vmatprep.subr.bf16.mxu1 %v990_v9 }
  0x18   : > { %s787_s8 = sshll.u32 %s1082_s7, 4  ;;  %s332_s27 = scalar_lea.vmem %s1194_s1, %s1082_s7 }
  0x19   : > { %s325_s11 = scalar_lea.vmem %s1193_s0, %s787_s8  ;;  %s338_s9 = scalar_lea.vmem %s1195_s2, %s1082_s7  ;;  %v772_v52 = vld [vmem:[%s332_s27] ss:$0 sm:$0xff] }
  0x1a   : > { %v355_v0 = vld [vmem:[%s325_s11] sm:$0xff]  ;;  %v356_v1 = vld [vmem:[%s325_s11 + $0x8] sm:$0xff]  ;;  %814 = vmatpush3.bf16.msra.mxu1 %v892_v35  ;;  %s764_s7 = sshll.u32 %s314_s10, 4  ;;  %s788_s11 = sshll.u32 %s980_s21, 8 }
  0x1b   : > { %v358_v2 = vsel %vm357_vm0, %v355_v0, 0.0  ;;  %v364_v3 = vmul.f32 %v355_v0, %v355_v0  ;;  %v365_v4 = vmul.f32 %v356_v1, %v356_v1  ;;  %v361_v6 = vsel %vm357_vm0, %v356_v1, 0.0  ;;  %815 = vmatprep.subr.bf16.mxu1 %v990_v9  ;;  %v773_v55 = vld [vmem:[%s338_s9] ss:$0 sm:$0xff]  ;;  %s316_s12 = scalar_lea.vmem [#allocation4], %s764_s7  ;;  %s1141_s16 = scalar_lea.hbm %s1198_s5, %s788_s11 }
  0x1c   : > { %359 = vadd.xlane.f32.xlu0 %v358_v2  ;;  %s621_s13 = sshll.u32 %s316_s12, 4  ;;  %s916_s27 = scalar_lea.vmem %s915_s25, 512  ;;  %s1143_s13 = int_to_ptr.vmem [resolvable:$true] %s621_s13 }
  0x1d   : > { %v366_v5 = vsel %vm357_vm0, %v364_v3, 0.0  ;;  %v369_v7 = vsel %vm357_vm0, %v365_v4, 0.0  ;;  %s910_s21 = scalar_lea.vmem %s1143_s13, 256  ;;  %p917_p1 = scmp.lt.s32.totalorder %s1143_s13, %s915_s25 }
  0x1e   : > { %367 = vadd.xlane.f32.xlu1 %v366_v5  ;;  %816 = vmatpush3.bf16.msra.mxu1 %v893_v36  ;;  %p911_p12 = scmp.ne.s32.totalorder %s1143_s13, %s910_s21  ;;  %p918_p2 = scmp.lt.s32.totalorder %s916_s27, %s910_s21 }
  0x1f   : > { %817 = vmatprep.subr.bf16.mxu1 %v990_v9 }
  0x20   : > { %362 = vadd.xlane.f32.xlu0 %v361_v6  ;;  %p912_p13 = pnand %p911_p12, %p1065_p4  ;;  %p919_p3 = por %p918_p2, %p917_p1 }
  0x22   : > { %370 = vadd.xlane.f32.xlu1 %v369_v7  ;;  %818 = vmatpush3.bf16.msra.mxu1 %v894_v37  ;;  %p913_p0 = pneg %p912_p13 }
  0x23   : > { %819 = vmatprep.subr.bf16.mxu1 %v990_v9 }
  0x24   : > { %p920_p5 = pnand %p919_p3, %p913_p0 }
  0x26   : > { %820 = vmatpush3.bf16.msra.mxu1 %v895_v38 }
  0x27   : > { %821 = vmatprep.subr.bf16.mxu1 %v990_v9 }
  0x2a   : > { %822 = vmatpush3.bf16.msra.mxu1 %v896_v39 }
  0x2b   : > { %823 = vmatprep.subr.bf16.mxu1 %v990_v9 }
  0x2e   : > { %824 = vmatpush3.bf16.msra.mxu1 %v897_v40 }
  0xa9   : > { %v360_v11 = vpop.xlane.xlu0 %359 }
  0xaa   : > { %v372_v12 = vmul.f32 0.03125, %v360_v11 }
  0xab   : > { %v368_v13 = vpop.xlane.xlu1 %367 }
  0xac   : > { %v376_v14 = vmul.f32 %v372_v12, %v372_v12  ;;  %v374_v15 = vmul.f32 0.03125, %v368_v13  ;;  %v380_v26 = vsub.f32 %v355_v0, %v372_v12  ;;  %v487_v0 = vld [vmem:[#allocation3 + $0x8] sm:$0xff] }
  0xad   : > { %v363_v16 = vpop.xlane.xlu0 %362 }
  0xae   : > { %v378_v17 = vsub.f32 %v374_v15, %v376_v14  ;;  %v373_v18 = vmul.f32 0.03125, %v363_v16 }
  0xaf   : > { %v371_v19 = vpop.xlane.xlu1 %370 }
  0xb0   : > { %v382_v20 = vmax.f32 %v378_v17, 1e-05  ;;  %v377_v21 = vmul.f32 %v373_v18, %v373_v18  ;;  %v375_v22 = vmul.f32 0.03125, %v371_v19  ;;  %v381_v27 = vsub.f32 %v356_v1, %v373_v18 }
  0xb2   : > { %v379_v23 = vsub.f32 %v375_v22, %v377_v21  ;;  %898 = vrsqrt.f32 %v382_v20 }
  0xb4   : > { %v383_v24 = vmax.f32 %v379_v23, 1e-05 }
  0xb6   : > { %900 = vrsqrt.f32 %v383_v24 }
  0xbc   : > { %v899_v25 = vpop.eup %898 }
  0xbd   : > { %v386_v29 = vmul.f32 %v899_v25, %v380_v26 }
  0xc0   : > { %v901_v28 = vpop.eup %900 }
  0xc1   : > { %v387_v30 = vmul.f32 %v901_v28, %v381_v27 }
  0xc3   : > { %v388_v31 = vpack.c.bf16 %v387_v30, %v386_v29 }
  0xc5   : > { %389 = vst.msk [vmem:[#allocation2] sm:$0xff] %vm357_vm0, %v388_v31 }
  0xcc   : > { %v392_v32 = vld [vmem:[#allocation2] sm:$0xff] }
  0xcd   : > { %806 = vmatmul.mubr.msk.bf16.vlgmr.msra.gmra.mrb[0].mxu0 %vm357_vm0, %v392_v32 }
 0x1a0   : > { %v447_v41 = vpop.f32.mrb[0].mxu0 }
 0x1a1   : > { %v770_v42 = vmul.f32 -1.442695, %v447_v41  ;;  %v807_v43 = vpop.f32.mrb[1].mxu0 }
 0x1a2   : > { %v450_v44 = vpop.f32.mrb[2].mxu0 }
 0x1a3   : > { %902 = vpow2.f32 %v770_v42  ;;  %v771_v45 = vmul.f32 -1.442695, %v450_v44  ;;  %v808_v46 = vpop.f32.mrb[3].mxu0 }
 0x1a5   : > { %904 = vpow2.f32 %v771_v45 }
 0x1ad   : > { %v903_v47 = vpop.eup %902 }
 0x1ae   : > { %v460_v48 = vadd.f32 1.0, %v903_v47 }
 0x1af   : > { %v905_v49 = vpop.eup %904 }
 0x1b0   : > { %906 = vrcp.f32 %v460_v48  ;;  %v461_v50 = vadd.f32 1.0, %v905_v49 }
 0x1b2   : > { %908 = vrcp.f32 %v461_v50 }
 0x1ba   : > { %v907_v51 = vpop.eup %906 }
 0x1bb   : > { %v466_v53 = vmul.f32 %v907_v51, %v447_v41 }
 0x1bc   : > { %v909_v54 = vpop.eup %908 }
 0x1bd   : > { %v475_v56 = vmul.f32 %v772_v52, %v466_v53  ;;  %v467_v57 = vmul.f32 %v909_v54, %v450_v44 }
 0x1bf   : > { %v484_v58 = vadd.f32 %v773_v55, %v475_v56  ;;  %v476_v59 = vmul.f32 %v772_v52, %v467_v57 }
 0x1c1   : > { %v485_v60 = vadd.f32 %v773_v55, %v476_v59 }
 0x1c3   : > { %v488_v61 = vpack.c.bf16 %v485_v60, %v484_v58 }
 0x1c5   : > { %826 = vmatmul.mubr.bf16.vlgmr.msra.gmra.mrb[0].mxu1 %v488_v61 }
 0x298   : > { %v587_v63 = vpop.f32.mrb[0].mxu1 }
 0x299   : > { %v594_v1 = vadd.f32 %v587_v63, %v486_v62  ;;  %v827_v2 = vpop.f32.mrb[1].mxu1 }
 0x29a   : > { %v590_v3 = vpop.f32.mrb[2].mxu1 }
 0x29b   : > { %596 = vst.msk [vmem:[#allocation3] sm:$0xff] %vm357_vm0, %v594_v1  ;;  %v595_v4 = vadd.f32 %v590_v3, %v487_v0  ;;  %v828_v5 = vpop.f32.mrb[3].mxu1 }
 0x29d   : > { %597 = vst.msk [vmem:[#allocation3 + $0x8] sm:$0xff] %vm357_vm0, %v595_v4 }
 0x2a2   : > { %v601_v6 = vld [vmem:[#allocation3] sm:$0xff] }
 0x2a3   : > { %603 = vst.msk [vmem:[%s316_s12] sm:$0xff] %vm357_vm0, %v601_v6 }
 0x2a4   : > { %v602_v7 = vld [vmem:[#allocation3 + $0x8] sm:$0xff] }
 0x2a5   : > { %604 = vst.msk [vmem:[%s316_s12 + $0x8] sm:$0xff] %vm357_vm0, %v602_v7 }
 0x2a6   : > { %923 = shalt.err (!%p920_p5)
}
 0x2a7   : > { %s924_s29 = scalar_lea.hbm %s1141_s16, 256  ;;  %s928_s10 = scalar_lea.hbm %s1198_s5, 512 }
 0x2a8   : > { %p925_p6 = scmp.ne.s32.totalorder %s1141_s16, %s924_s29  ;;  %p929_p10 = scmp.lt.u32.totalorder %s1141_s16, %s1198_s5 }
 0x2a9   : > { %p930_p11 = scmp.lt.u32.totalorder %s928_s10, %s924_s29  ;;  %p932_p13 = scmp.lt.u32.totalorder %s924_s29, %s1141_s16 }
 0x2aa   : > { %p926_p7 = pnand %p925_p6, %p1065_p4 }
 0x2ab   : > { %p931_p12 = por %p930_p11, %p929_p10 }
 0x2ac   : > { %p927_p9 = pneg %p926_p7 }
 0x2ad   : > { %p933_p0 = por %p932_p13, %p931_p12 }
 0x2af   : > { %p934_p1 = pnand %p933_p0, %p927_p9 }
 0x2b1   : > { %937 = shalt.err (!%p934_p1)
}
 0x2b2   : > { %s993_s12 = smov 128   ;;  %s994_s14 = smov 8  }
 0x2b3   : > { %829 = dma.vmem_to_hbm [thread:$0]  (%p1065_p4), %s1143_s13, 256, %s1141_s16, %s1147_s17, %s993_s12, %s993_s12, %s994_s14  }
 0x2b4 PF: > { %p835_p2 = scmp.ge.s32.totalorder %s988_s23, 2  ;;  %s636_s15 = sand.u32 1, %s968_s18  }
 0x2b5   : > { %s637_s21 = scalar_lea.sflag [#allocation5], %s636_s15 }
 0x2b6   : > { %p832_p3 = pnand %p835_p2, %p1072_p8 }
 0x2b8   : > { %963 = dma.done.wait (!%p832_p3), %s637_s21, 256  }
 0x2b9   : > { %965 = vsyncadd (!%p832_p3), %s637_s21, 4294967040  ;;  %s18_s23 = sadd.s32 1, %s988_s23   ;;  %s1201_s18 = smov %s972_s19 }
 0x2ba   : > { %p15_p5 = scmp.ge.s32.totalorder %s18_s23, 4   ;;  %s1202_s19 = smov %s976_s20 }
 0x2bb   : > { %s1203_s20 = smov %s1078_s6  ;;  %s1204_s21 = smov %s984_s22 }
 0x2bc   : > { %s1205_s22 = smov %s1207_s26  ;;  %17 = sbr.rel (!%p15_p5) target bundleno = 4 (0x4), region = 95 }
 0x2c3   :  { %642 = vsyncpa [#allocation5], 1 }
 0x2c4   :  { %644 = vsyncpa [#allocation5 + $0x1], 1 }

</bundles_post_ra>
